<compile_context>
chip_gen: v7x
topology: tpu7x:2x2x1
jax: 0.10.0
libtpu: 0.0.40
codegen_flags: <defaults>
</compile_context>

<pallas_src>
import jax
import jax.numpy as jnp
from jax import lax
from jax.experimental import pallas as pl
from jax.experimental.pallas import tpu as pltpu


def _tables(dim, rows_per_line, line):
    """Grid-invariant tables, computed ONCE in the wrapper (hoisted out of kernel).

    Returns:
      sel:        (Kp, line) f32 one-hot scatter table: sel[k, k*dim + d] = 1.
      freq_line:  (1, line)  f32 per-lane frequency (exact PyTorch formula).
      phase_line: (1, line)  f32 per-lane phase: 0 for sin lanes, pi/2 for cos lanes.
      Kp:         contraction length padded to a multiple of 8.
    """
    half = dim // 2
    j = jnp.arange(half)
    # Exact (non-standard, per-spec) PyTorch formula: 1 / 0.001 ** (2*(j//2)/half).
    freq_half = 1.0 / 0.001 ** ((2 * (j // 2)).astype(jnp.float32) / half)
    freq_row = jnp.concatenate([freq_half, freq_half]).astype(jnp.float32)       # (dim,)
    phase_row = jnp.concatenate(
        [jnp.zeros((half,), jnp.float32),
         jnp.full((half,), jnp.pi / 2, jnp.float32)])                            # (dim,)

    R = rows_per_line
    Kp = ((R + 7) // 8) * 8
    # sel[k, r*dim + d] = 1 if r == k else 0  (block-diagonal of ones rows).
    sel = jnp.kron(jnp.eye(R, dtype=jnp.float32),
                   jnp.ones((1, dim), jnp.float32))                              # (R, R*dim)
    sel = jnp.pad(sel, ((0, Kp - R), (0, line - R * dim)))                        # (Kp, line)
    freq_line = jnp.pad(jnp.tile(freq_row, R), (0, line - R * dim)).reshape(1, line)
    phase_line = jnp.pad(jnp.tile(phase_row, R), (0, line - R * dim)).reshape(1, line)
    return sel, freq_line, phase_line, Kp


def _pos_emb_kernel(x_ref, sel_ref, freq_ref, phase_ref, o_ref):
    """One batch tile.

    x_ref:     (TB, Kp)   f32 packed timesteps (cols >= rows_per_line are zero)
    sel_ref:   (Kp, line) f32 one-hot scatter table (grid-invariant)
    freq_ref:  (1, line)  f32 per-lane frequency   (grid-invariant)
    phase_ref: (1, line)  f32 per-lane phase       (grid-invariant)
    o_ref:     (TB, line) f32
    """
    # Broadcast each timestep across its dim-wide lane group on the (idle) MXU.
    # sel is 0/1 (bf16-exact) and precision is HIGHEST, so xb == x per lane group.
    xb = jnp.dot(x_ref[...], sel_ref[...],
                 preferred_element_type=jnp.float32,
                 precision=lax.Precision.HIGHEST)
    # One transcendental per lane: cos(t) = sin(t + pi/2).
    o_ref[...] = jnp.sin(xb * freq_ref[...] + phase_ref[...])


def sinusoidal_pos_emb(x, dim, *, max_block_rows=8192, small_size_bypass=False):
    """Pallas implementation of SinusoidalPosEmb.forward.

    Args:
      x:   (B,) array of (float) timesteps.
      dim: embedding dimension (must be even); output shape is (B, dim).
      small_size_bypass: if True and B*dim is tiny, compute with plain jnp
        (the kernel is pure launch overhead at such sizes).  Off by default
        so this script always exercises the Pallas path.
    """
    assert x.ndim == 1, "expected a 1-D batch of timesteps"
    assert dim % 2 == 0, "dim must be even (torch.cat((sin, cos)) convention)"
    B = x.shape[0]
    half = dim // 2
    x = x.astype(jnp.float32)

    if small_size_bypass and B * dim <= (1 << 16):
        j = jnp.arange(half)
        freq = 1.0 / 0.001 ** ((2 * (j // 2)).astype(jnp.float32) / half)
        emb = x[:, None] * freq[None, :]
        return jnp.concatenate([jnp.sin(emb), jnp.cos(emb)], axis=-1)

    # ---- Lane-dense packing -------------------------------------------------
    if dim < 128 and 128 % dim == 0:
        rows_per_line = 128 // dim          # pack R batch rows per 128-lane line
        line = 128
    elif dim % 128 == 0:
        rows_per_line = 1                   # already lane-dense
        line = dim
    else:
        rows_per_line = 1                   # awkward dim: pad lanes to x128,
        line = ((dim + 127) // 128) * 128   # strip after the kernel
    R = rows_per_line

    sel, freq_line, phase_line, Kp = _tables(dim, R, line)

    # ---- Batch tiling ---------------------------------------------------------
    n_lines = pl.cdiv(B, R)
    budget_rows = max(8, (4 << 20) // (line * 4))      # <= ~4 MiB output / step
    tb = max(8, min(max_block_rows, budget_rows))
    tb -= tb % 8
    if n_lines <= 8:
        tb = 8
        grid_steps = 1
    elif n_lines <= tb:
        # Split mid-sized batches into 2 tiles so v7x's two TensorCores both
        # get a grid step (neutral on single-TC v5e/v6e).
        tb = ((pl.cdiv(n_lines, 2) + 7) // 8) * 8
        grid_steps = 2
    else:
        grid_steps = pl.cdiv(n_lines, tb)
    n_lines_pad = grid_steps * tb

    # ---- Pack timesteps (avoid the pad/slice round-trip when possible) ------
    rows_needed = n_lines_pad * R
    padded = rows_needed != B
    if padded:
        xr = jnp.zeros((rows_needed,), jnp.float32).at[:B].set(x)
    else:
        xr = x
    xr = xr.reshape(n_lines_pad, R)
    if Kp > R:
        xr = jnp.pad(xr, ((0, 0), (0, Kp - R)))        # zero contraction padding

    out_packed = pl.pallas_call(
        _pos_emb_kernel,
        out_shape=jax.ShapeDtypeStruct((n_lines_pad, line), jnp.float32),
        grid=(grid_steps,),
        in_specs=[
            pl.BlockSpec((tb, Kp), lambda i: (i, 0)),
            pl.BlockSpec((Kp, line), lambda i: (0, 0)),
            pl.BlockSpec((1, line), lambda i: (0, 0)),
            pl.BlockSpec((1, line), lambda i: (0, 0)),
        ],
        out_specs=pl.BlockSpec((tb, line), lambda i: (i, 0)),
        compiler_params=pltpu.CompilerParams(
            dimension_semantics=("parallel",)),
    )(xr, sel, freq_line, phase_line)

    # ---- Unpack ---------------------------------------------------------------
    if line == R * dim:
        out = out_packed.reshape(n_lines_pad * R, dim)  # free row-major view
        return out[:B] if padded else out
    # R == 1 with lane padding: strip padded lanes (and padded rows, if any).
    return out_packed[:B, :dim]


def _reference(x, dim):
    """Pure-JAX reference mirroring the PyTorch forward exactly."""
    half = dim // 2
    j = jnp.arange(half)
    freq = 1.0 / 0.001 ** ((2 * (j // 2)).astype(jnp.float32) / half)
    emb = x[:, None].astype(jnp.float32) * freq[None, :]
    return jnp.concatenate([jnp.sin(emb), jnp.cos(emb)], axis=-1)


if __name__ == "__main__":
    key = jax.random.PRNGKey(0)
    B, dim = 8, 32
    # Normalized diffusion timesteps in [0, 1).
    x = jax.random.uniform(key, (B,), dtype=jnp.float32)

    out = jax.block_until_ready(sinusoidal_pos_emb(x, dim))
    ref = _reference(x, dim)

    assert out.shape == (B, dim), out.shape
    err = float(jnp.max(jnp.abs(out - ref)))
    # Same hoisted f32 freq table and same f32 multiply as the reference; the
    # only deltas are the cos->sin(t+pi/2) fold and sin argument-reduction ULPs.
    assert err < 1e-3, "max abs diff = %e" % err
    print("KERNEL_OK")
</pallas_src>

<mosaic_0001>
module attributes {stable_mosaic.version = 11 : i64} {
  func.func @_pos_emb_kernel(%arg0: i32, %arg1: memref<8x8xf32, #tpu.memory_space<vmem>>, %arg2: memref<8x128xf32, #tpu.memory_space<vmem>>, %arg3: memref<1x128xf32, #tpu.memory_space<vmem>>, %arg4: memref<1x128xf32, #tpu.memory_space<vmem>>, %arg5: memref<8x128xf32, #tpu.memory_space<vmem>>) attributes {dimension_semantics = [#tpu.dimension_semantics<parallel>], iteration_bounds = array<i64: 1>, scalar_prefetch = 0 : i64, scratch_operands = 0 : i64, tpu.core_type = #tpu.core_type<tc>, window_params = [{transform_indices = @transform_0, window_bounds = array<i64: 8, 8>}, {pipeline_mode = #tpu.pipeline_mode<synchronous>, transform_indices = @transform_1, window_bounds = array<i64: 8, 128>}, {pipeline_mode = #tpu.pipeline_mode<synchronous>, transform_indices = @transform_2, window_bounds = array<i64: 1, 128>}, {pipeline_mode = #tpu.pipeline_mode<synchronous>, transform_indices = @transform_3, window_bounds = array<i64: 1, 128>}, {transform_indices = @transform_4, window_bounds = array<i64: 8, 128>}]} {
    %c0 = arith.constant 0 : index
    %c0_0 = arith.constant 0 : index
    %0 = vector.load %arg1[%c0, %c0_0] : memref<8x8xf32, #tpu.memory_space<vmem>>, vector<8x8xf32>
    %c0_1 = arith.constant 0 : index
    %c0_2 = arith.constant 0 : index
    %1 = vector.load %arg2[%c0_1, %c0_2] : memref<8x128xf32, #tpu.memory_space<vmem>>, vector<8x128xf32>
    %cst = arith.constant dense<0.000000e+00> : vector<8x128xf32>
    %2 = tpu.matmul %0, %1, %cst {dimension_numbers = #tpu.dot_dimension_numbers<[1], [0], [0], [1], [0, 0, 1, 1], [], []>, precision = #tpu.contract_precision<fp32>} : vector<8x8xf32>, vector<8x128xf32>, vector<8x128xf32> -> vector<8x128xf32>
    %c0_3 = arith.constant 0 : index
    %c0_4 = arith.constant 0 : index
    %3 = vector.load %arg3[%c0_3, %c0_4] : memref<1x128xf32, #tpu.memory_space<vmem>>, vector<1x128xf32>
    %4 = vector.broadcast %3 : vector<1x128xf32> to vector<8x128xf32>
    %5 = arith.mulf %2, %4 : vector<8x128xf32>
    %c0_5 = arith.constant 0 : index
    %c0_6 = arith.constant 0 : index
    %6 = vector.load %arg4[%c0_5, %c0_6] : memref<1x128xf32, #tpu.memory_space<vmem>>, vector<1x128xf32>
    %7 = vector.broadcast %6 : vector<1x128xf32> to vector<8x128xf32>
    %8 = arith.addf %5, %7 : vector<8x128xf32>
    %9 = math.sin %8 : vector<8x128xf32>
    %c0_7 = arith.constant 0 : index
    %c0_8 = arith.constant 0 : index
    %10 = vector.load %arg5[%c0_7, %c0_8] : memref<8x128xf32, #tpu.memory_space<vmem>>, vector<8x128xf32>
    tpu.vector_store %arg5[%c0_7, %c0_8], %9 {strides = array<i32>} : memref<8x128xf32, #tpu.memory_space<vmem>>, vector<8x128xf32>,
    return
  }
  func.func @transform_0(%arg0: i32) -> (i32, i32) {
    %c0_i32 = arith.constant 0 : i32
    %c0_i32_0 = arith.constant 0 : i32
    return %arg0, %c0_i32 : i32, i32
  }
  func.func @transform_1(%arg0: i32) -> (i32, i32) {
    %c0_i32 = arith.constant 0 : i32
    %c0_i32_0 = arith.constant 0 : i32
    %c0_i32_1 = arith.constant 0 : i32
    return %c0_i32, %c0_i32_0 : i32, i32
  }
  func.func @transform_2(%arg0: i32) -> (i32, i32) {
    %c0_i32 = arith.constant 0 : i32
    %c0_i32_0 = arith.constant 0 : i32
    %c0_i32_1 = arith.constant 0 : i32
    return %c0_i32, %c0_i32_0 : i32, i32
  }
  func.func @transform_3(%arg0: i32) -> (i32, i32) {
    %c0_i32 = arith.constant 0 : i32
    %c0_i32_0 = arith.constant 0 : i32
    %c0_i32_1 = arith.constant 0 : i32
    return %c0_i32, %c0_i32_0 : i32, i32
  }
  func.func @transform_4(%arg0: i32) -> (i32, i32) {
    %c0_i32 = arith.constant 0 : i32
    %c0_i32_0 = arith.constant 0 : i32
    return %arg0, %c0_i32 : i32, i32
  }
}

</mosaic_0001>

<bundles_post_ra>
// kernel: tpu_custom_call.1
= control target key start
LH: loop header
LB: loop body
LE: loop exit
PB: predicated region body
PF: predicated region fallthrough
CT: control target
= control target key end

     0   :  { %9 = vsyncpa [#allocation3], 0  ;;  %s884_s0 = inlined_call_operand.hbm [shape: f32[8,8], index: 0, kind: input, shape index: {}]   ;;  %s885_s1 = inlined_call_operand.hbm [shape: f32[8,128], index: 1, kind: input, shape index: {}]   ;;  %s886_s2 = inlined_call_operand.vmem [shape: f32[1,128], index: 2, kind: input, shape index: {}]   ;;  %s887_s3 = inlined_call_operand.vmem [shape: f32[1,128], index: 3, kind: input, shape index: {}]   ;;  %s888_s4 = inlined_call_operand.hbm [shape: f32[8,128], index: 4, kind: output, shape index: {}]  }
   0x1   :  { %10 = vsyncpa [#allocation6], 0 }
   0x2   :  { %11 = vsyncpa [#allocation4], 0  ;;  %s779_s15 = smov [#allocation2]   ;;  %s780_s17 = smov [#allocation5]  }
   0x3   :  { %s18_s16 = sshll.u32 %s779_s15, 4  ;;  %s28_s18 = sshll.u32 %s780_s17, 4  ;;  %s19_s16 = int_to_ptr.vmem [resolvable:$true] %s18_s16  ;;  %s29_s18 = int_to_ptr.vmem [resolvable:$true] %s28_s18 }
   0x4   :  { %s707_s21 = scalar_lea.hbm %s884_s0, 128 }
   0x5   :  { %p708_p0 = scmp.ne.s32.totalorder %s884_s0, %s707_s21  ;;  %p711_p1 = scmp.lt.u32.totalorder %s707_s21, %s884_s0 }
   0x7   :  { %p713_p2 = pnand %p711_p1, %p708_p0 }
   0x9   :  { %716 = shalt.err (!%p713_p2)
}
   0xa   :  { %s717_s26 = scalar_lea.vmem %s19_s16, 128  ;;  %p722_p4 = scmp.lt.s32.totalorder %s19_s16, %s19_s16 }
   0xb   :  { %p718_p3 = scmp.ne.s32.totalorder %s19_s16, %s717_s26  ;;  %p723_p5 = scmp.lt.s32.totalorder %s717_s26, %s717_s26 }
   0xd   :  { %p724_p6 = por %p723_p5, %p722_p4 }
   0xf   :  { %p725_p7 = pnand %p724_p6, %p718_p3 }
  0x11   :  { %728 = shalt.err (!%p725_p7)
}
  0x12   :  { %21 = dma.hbm_to_vmem [thread:$0]  %s884_s0, 128, %s19_s16, [#allocation3]  }
  0x13   :  { %s729_s5 = scalar_lea.hbm %s885_s1, 128 }
  0x14   :  { %p730_p8 = scmp.ne.s32.totalorder %s885_s1, %s729_s5  ;;  %p733_p9 = scmp.lt.u32.totalorder %s729_s5, %s885_s1 }
  0x16   :  { %p735_p10 = pnand %p733_p9, %p730_p8 }
  0x18   :  { %738 = shalt.err (!%p735_p10)
}
  0x19   :  { %s739_s10 = scalar_lea.vmem %s29_s18, 128  ;;  %p744_p12 = scmp.lt.s32.totalorder %s29_s18, %s29_s18 }
  0x1a   :  { %p740_p11 = scmp.ne.s32.totalorder %s29_s18, %s739_s10  ;;  %p745_p13 = scmp.lt.s32.totalorder %s739_s10, %s739_s10 }
  0x1c   :  { %p746_p0 = por %p745_p13, %p744_p12 }
  0x1e   :  { %p747_p1 = pnand %p746_p0, %p740_p11 }
  0x20   :  { %750 = shalt.err (!%p747_p1)
}
  0x21   :  { %31 = dma.hbm_to_vmem [thread:$0]  %s885_s1, 128, %s29_s18, [#allocation6]  }
  0x22   :  { %773 = dma.done.wait [#allocation3], 128  }
  0x23   :  { %774 = vsyncadd [#allocation3], 4294967168 }
  0x24   :  { %775 = dma.done.wait [#allocation6], 128  }
  0x25   :  { %776 = vsyncadd [#allocation6], 4294967168  ;;  %v781_v0 = vmov 0.0   ;;  %vm782_vm0 = vmmov 0   ;;  %vm44_vm1 = vcmask 64512   ;;  %v43_v1 = vld [vmem:[#allocation5] sm:$0xff] }
  0x26   :  { %664 = vmatprep.subr.mxu0 %v781_v0  ;;  %666 = vmatprep.mubr.msk.f32.mxu0 %vm782_vm0, %v781_v0  ;;  %v42_v2 = vld [vmem:[#allocation2] sm:$0xff]  ;;  %v49_v3 = vand.u32 4294901760, %v43_v1  ;;  %v783_v33 = vmov 683565275   ;;  %v784_v35 = vmov 2475754826  }
  0x27   :  { %649 = vmatprep.subr.mxu1 %v781_v0  ;;  %651 = vmatprep.mubr.msk.f32.mxu1 %vm782_vm0, %v781_v0  ;;  %v46_v4 = vsel %vm44_vm1, %v42_v2, 0  ;;  %v631_v17 = vld [vmem:[%s886_s2] ss:$0 sm:$0xff]  ;;  %v785_v38 = vmov 2131351028   ;;  %s789_s2 = smov [#allocation7]  }
  0x28   :  { %v114_v5 = vand.u32 4294901760, %v46_v4  ;;  %v126_v6 = vsub.f32 %v43_v1, %v49_v3  ;;  %665 = vmatpush3.msra.mxu0 %v49_v3  ;;  %650 = vmatpush3.msra.mxu1 %v49_v3  ;;  %v632_v20 = vld [vmem:[%s887_s3] ss:$0 sm:$0xff]  ;;  %v786_v41 = vmov 2102212464   ;;  %s621_s3 = sshll.u32 %s789_s2, 4  ;;  %s622_s3 = int_to_ptr.vmem [resolvable:$true] %s621_s3 }
  0x29   :  { %654 = vmatprep.subr.mxu1 %v781_v0  ;;  %669 = vmatprep.subr.mxu0 %v781_v0  ;;  %v787_v44 = vmov 920167782   ;;  %v788_v47 = vmov 1326507024   ;;  %s751_s15 = scalar_lea.vmem %s622_s3, 128  ;;  %p756_p3 = scmp.lt.s32.totalorder %s622_s3, %s622_s3 }
  0x2a   :  { %v115_v7 = vsub.f32 %v46_v4, %v114_v5  ;;  %v127_v8 = vand.u32 4294901760, %v126_v6  ;;  %p752_p2 = scmp.ne.s32.totalorder %s622_s3, %s751_s15  ;;  %p757_p4 = scmp.lt.s32.totalorder %s751_s15, %s751_s15 }
  0x2c   :  { %v116_v9 = vand.u32 4294901760, %v115_v7  ;;  %v128_v10 = vsub.f32 %v126_v6, %v127_v8  ;;  %p758_p5 = por %p757_p4, %p756_p3 }
  0x2e   :  { %667 = vmatmul.mubr.f32.vlgmr.msra.gmra.mrb[0].mxu0 %v116_v9  ;;  %v117_v11 = vsub.f32 %v115_v7, %v116_v9  ;;  %v129_v12 = vand.u32 4294901760, %v128_v10  ;;  %p759_p6 = pnand %p758_p5, %p752_p2 }
  0x2f   :  { %670 = vmatpush3.msra.mxu0 %v127_v8  ;;  %671 = vmatprep.mubr.msk.f32.mxu0 %vm782_vm0, %v781_v0 }
  0x30   :  { %v118_v13 = vand.u32 4294901760, %v117_v11  ;;  %674 = vmatprep.subr.mxu0 %v781_v0 }
  0x32   :  { %652 = vmatmul.mubr.f32.vlgmr.msra.gmra.mrb[0].mxu1 %v118_v13 }
  0x33   :  { %655 = vmatpush3.msra.mxu1 %v129_v12  ;;  %656 = vmatprep.mubr.msk.f32.mxu1 %vm782_vm0, %v781_v0 }
  0x34   :  { %659 = vmatprep.subr.mxu1 %v781_v0 }
  0x36   :  { %672 = vmatmul.mubr.f32.vlgmr.msra.gmra.mrb[0].mxu0 %v114_v5 }
  0x37   :  { %675 = vmatpush3.msra.mxu0 %v49_v3  ;;  %676 = vmatprep.mubr.msk.f32.mxu0 %vm782_vm0, %v781_v0 }
  0x3a   :  { %657 = vmatmul.mubr.f32.vlgmr.msra.gmra.mrb[0].mxu1 %v114_v5 }
  0x3b   :  { %660 = vmatpush3.msra.mxu1 %v126_v6  ;;  %661 = vmatprep.mubr.msk.f32.mxu1 %vm782_vm0, %v781_v0 }
  0x3e   :  { %677 = vmatmul.mubr.f32.vlgmr.msra.gmra.mrb[0].mxu0 %v114_v5 }
  0x42   :  { %662 = vmatmul.mubr.f32.vlgmr.msra.gmra.mrb[0].mxu1 %v115_v7 }
 0x111   :  { %v490_v14 = vpop.f32.mrb[0].mxu0 }
 0x112   :  { %v678_v15 = vpop.f32.mrb[1].mxu0 }
 0x115   :  { %v270_v16 = vpop.f32.mrb[0].mxu1 }
 0x116   :  { %v679_v18 = vadd.f32 %v490_v14, %v270_v16  ;;  %v663_v19 = vpop.f32.mrb[1].mxu1 }
 0x118   :  { %v501_v21 = vmul.f32 %v679_v18, %v631_v17 }
 0x11a   :  { %v851_v22 = vadd.f32 %v632_v20, %v501_v21 }
 0x11c   :  { %v513_v23 = vand.u32 2139095040, %v851_v22  ;;  %v510_v27 = vand.u32 2147483647, %v851_v22  ;;  %vm512_vm9 = vcmp.lt.s32.totalorder %v851_v22, 0  ;;  %vm602_vm14 = vweird.f32 %v851_v22 }
 0x11e   :  { %v514_v24 = vshrl.u32 %v513_v23, 23  ;;  %v517_v31 = vand.u32 8388607, %v510_v27  ;;  %vm511_vm10 = vcmp.le.f32.partialorder %v510_v27, 0.7853982 }
 0x120   :  { %v633_v25 = vadd.s32 4294967169, %v514_v24  ;;  %v518_v49 = vor.u32 8388608, %v517_v31 }
 0x122   :  { %v520_v26 = vadd.s32 1, %v633_v25  ;;  %v558_v63 = vshll.u32 %v518_v49, 8 }
 0x124   :  { %vm521_vm2 = vcmp.gt.s32.totalorder %v520_v26, 0 }
 0x125   :  { %v522_v28 = vsel %vm521_vm2, %v520_v26, 0 }
 0x126   :  { %v524_v29 = vand.u32 31, %v522_v28  ;;  %v523_v32 = vshrl.u32 %v522_v28, 5 }
 0x128   :  { %v525_v30 = vsub.s32 32, %v524_v29  ;;  %v527_v34 = vshll.u32 %v783_v33, %v524_v29  ;;  %v530_v36 = vshll.u32 %v784_v35, %v524_v29  ;;  %v533_v40 = vshll.u32 %v785_v38, %v524_v29 }
 0x129   :  { %v536_v43 = vshll.u32 %v786_v41, %v524_v29  ;;  %v539_v46 = vshll.u32 %v787_v44, %v524_v29  ;;  %vm542_vm3 = vcmp.lt.s32.totalorder %v523_v32, 1  ;;  %vm545_vm4 = vcmp.lt.s32.totalorder %v523_v32, 4 }
 0x12a   :  { %v528_v37 = vshrl.u32 %v784_v35, %v525_v30  ;;  %v531_v39 = vshrl.u32 %v785_v38, %v525_v30  ;;  %v534_v42 = vshrl.u32 %v786_v41, %v525_v30  ;;  %v537_v45 = vshrl.u32 %v787_v44, %v525_v30 }
 0x12b   :  { %v540_v48 = vshrl.u32 %v788_v47, %v525_v30  ;;  %v526_v58 = vshrl.u32 %v783_v33, %v525_v30  ;;  %vm544_vm5 = vcmp.lt.s32.totalorder %v523_v32, 3  ;;  %vm543_vm6 = vcmp.lt.s32.totalorder %v523_v32, 2 }
 0x12c   :  { %v529_v50 = vor.u32 %v528_v37, %v527_v34  ;;  %v532_v51 = vor.u32 %v531_v39, %v530_v36  ;;  %v535_v52 = vor.u32 %v534_v42, %v533_v40  ;;  %v538_v53 = vor.u32 %v537_v45, %v536_v43 }
 0x12d   :  { %v541_v54 = vor.u32 %v540_v48, %v539_v46 }
 0x12e   :  { %v547_v55 = vsel %vm545_vm4, %v535_v52, 2102212464  ;;  %v550_v56 = vsel %vm542_vm3, %v529_v50, %v532_v51  ;;  %v554_v57 = vsel %vm542_vm3, %v532_v51, %v535_v52  ;;  %v551_v59 = vsel %vm545_vm4, %v538_v53, 920167782 }
 0x12f   :  { %v555_v60 = vsel %vm545_vm4, %v541_v54, 1326507024  ;;  %v552_v61 = vsel %vm544_vm5, %v535_v52, %v551_v59  ;;  %v546_v0 = vsel %vm542_vm3, %v526_v58, %v529_v50  ;;  %v548_v1 = vsel %vm544_vm5, %v532_v51, %v547_v55 }
 0x130   :  { %v556_v62 = vsel %vm544_vm5, %v538_v53, %v555_v60  ;;  %v553_v2 = vsel %vm543_vm6, %v550_v56, %v552_v61  ;;  %v549_v8 = vsel %vm543_vm6, %v546_v0, %v548_v1 }
 0x131   :  { %v557_v3 = vsel %vm543_vm6, %v554_v57, %v556_v62  ;;  %v860_v6 = vmul.u32.u64.low %v558_v63, %v553_v2  ;;  %v861_v7 = vmul.u32.u64.high %v558_v63, %v553_v2, %v860_v6  ;;  %v565_v10 = vmul.u32 %v558_v63, %v549_v8 }
 0x132   :  { %v857_v4 = vmul.u32.u64.low %v558_v63, %v557_v3  ;;  %v858_v5 = vmul.u32.u64.high %v558_v63, %v557_v3, %v857_v4 }
 0x133   :  { %v568_v9 = vadd.s32 1, %v861_v7 }
 0x134   :  { %vm567_vm7 = vc.u32 %v858_v5, %v860_v6  ;;  %v566_v23 = vadd.s32 %v860_v6, %v858_v5 }
 0x135   :  { %v569_v11 = vsel %vm567_vm7, %v568_v9, %v861_v7 }
 0x136   :  { %v570_v12 = vadd.s32 %v569_v11, %v565_v10 }
 0x138   :  { %v571_v13 = vadd.s32 536870912, %v570_v12 }
 0x13a   :  { %v572_v14 = vshrl.u32 %v571_v13, 30 }
 0x13c   :  { %v573_v15 = vshll.u32 %v572_v14, 30  ;;  %v596_v36 = vsub.s32 4, %v572_v14 }
 0x13e   :  { %v574_v16 = vsub.s32 %v570_v12, %v573_v15  ;;  %v597_v39 = vsel %vm512_vm9, %v596_v36, %v572_v14 }
 0x13f   :  { %v599_v41 = vsel %vm511_vm10, 0, %v597_v39 }
 0x140   :  { %v576_v17 = vsub.s32 0, %v574_v16  ;;  %v603_v42 = vadd.s32 3, %v599_v41 }
 0x142   :  { %v634_v18 = vmin.u32 %v576_v17, %v574_v16  ;;  %v604_v43 = vand.u32 3, %v603_v42 }
 0x144   :  { %v578_v19 = vclz %v634_v18  ;;  %vm609_vm11 = vcmp.eq.s32.totalorder %v604_v43, 2  ;;  %vm606_vm12 = vcmp.eq.s32.totalorder %v604_v43, 0  ;;  %vm605_vm13 = vcmp.lt.s32.totalorder %v604_v43, 2 }
 0x146   :  { %v635_v20 = vadd.s32 4294967294, %v578_v19 }
 0x148   :  { %vm636_vm8 = vcmp.lt.s32.totalorder %v635_v20, 0 }
 0x149   :  { %v581_v21 = vsel %vm636_vm8, 0, %v635_v20 }
 0x14a   :  { %v582_v24 = vsub.s32 32, %v581_v21  ;;  %v586_v25 = vsub.s32 4294967266, %v581_v21  ;;  %v583_v26 = vshll.u32 %v574_v16, %v581_v21 }
 0x14c   :  { %v584_v28 = vshrl.u32 %v566_v23, %v582_v24  ;;  %v587_v29 = vadd.s32 127, %v586_v25 }
 0x14e   :  { %v585_v30 = vor.u32 %v584_v28, %v583_v26  ;;  %v588_v31 = vshll.u32 %v587_v29, 23 }
 0x150   :  { %v589_v32 = vor.u32 4788187, %v588_v31  ;;  %v592_v34 = vcvt.s32.f32 %v585_v30 }
 0x152   :  { %v590_v33 = vand.u32 2147483647, %v589_v32 }
 0x154   :  { %v593_v35 = vmul.f32 %v592_v34, %v590_v33 }
 0x156   :  { %v594_v37 = vxor.u32 2147483648, %v593_v35 }
 0x158   :  { %v595_v38 = vsel %vm512_vm9, %v594_v37, %v593_v35 }
 0x159   :  { %v598_v40 = vsel %vm511_vm10, %v851_v22, %v595_v38 }
 0x15a   :  { %703 = vcosq.f32 %v598_v40 }
 0x15b   :  { %705 = vsinq.f32 %v598_v40 }
 0x164   :  { %v704_v44 = vpop.eup %703 }
 0x165   :  { %v706_v45 = vpop.eup %705  ;;  %v610_v46 = vxor.u32 2147483648, %v704_v44 }
 0x166   :  { %v607_v47 = vxor.u32 2147483648, %v706_v45 }
 0x167   :  { %v611_v48 = vsel %vm609_vm11, %v610_v46, %v706_v45 }
 0x168   :  { %v608_v27 = vsel %vm606_vm12, %v704_v44, %v607_v47 }
 0x169   :  { %v612_v49 = vsel %vm605_vm13, %v608_v27, %v611_v48 }
 0x16a   :  { %v613_v50 = vsel %vm602_vm14, nan, %v612_v49 }
 0x16b   :  { %614 = vst [vmem:[#allocation7] sm:$0xff] %v613_v50 }
 0x16c   :  { %762 = shalt.err (!%p759_p6)
}
 0x16d   :  { %s763_s18 = scalar_lea.hbm %s888_s4, 128 }
 0x16e   :  { %p764_p7 = scmp.ne.s32.totalorder %s888_s4, %s763_s18  ;;  %p767_p8 = scmp.lt.u32.totalorder %s763_s18, %s888_s4 }
 0x170   :  { %p769_p9 = pnand %p767_p8, %p764_p7 }
 0x172   :  { %772 = shalt.err (!%p769_p9)
}
 0x173   :  { %624 = dma.vmem_to_hbm [thread:$0]  %s622_s3, 128, %s888_s4, [#allocation4]  }
 0x174   :  { %777 = dma.done.wait [#allocation4], 128  }
 0x175   :  { %778 = vsyncadd [#allocation4], 4294967168 }
 0x176   :  { %628 = vsyncpa [#allocation3], 1 }
 0x177   :  { %629 = vsyncpa [#allocation6], 1 }
 0x178   :  { %630 = vsyncpa [#allocation4], 1 }

</bundles_post_ra>
